<compile_context>
chip_gen: v5e
topology: v5e:2x2
jax: 0.10.0
libtpu: 0.0.40
codegen_flags: <defaults>
</compile_context>

<pallas_src>
import functools

import jax
import jax.numpy as jnp
from jax.experimental import pallas as pl
from jax.experimental.pallas import tpu as pltpu

_LANE = 128
_SUBLANE = 8
_TILE_BYTES_PER_INPUT = 4 * 1024 * 1024   # ~4 MiB per input per pipeline buffer
_VMEM_LIMIT_BYTES = 40 * 1024 * 1024      # headroom under v7x's 64 MiB physical VMEM


def _loss_kernel_3d(pred_ref, tgt_ref, out_ref, acc_ref, *,
                    scale, rows_total, rows_per_block, mask_rows):
    """Grid step for the lane-dense (Bv, R, 128) layout."""
    k = pl.program_id(1)
    nk = pl.num_programs(1)

    @pl.when(k == 0)
    def _():
        acc_ref[...] = jnp.zeros_like(acc_ref)

    def accumulate(apply_mask):
        d = pred_ref[...].astype(jnp.float32) - tgt_ref[...].astype(jnp.float32)
        sq = d * d                                        # (bt, T, 128)
        if apply_mask:
            rows = (jax.lax.broadcasted_iota(jnp.int32, sq.shape, 1)
                    + k * rows_per_block)
            sq = jnp.where(rows < rows_total, sq, 0.0)
        bt, t = sq.shape[0], sq.shape[1]
        if t % _SUBLANE == 0:
            # Cross-vreg VPU reduce into a sublane-packed (bt, 8, 128) acc;
            # the reshape is layout-preserving (splits the sublane axis only).
            acc_ref[...] += jnp.sum(
                sq.reshape(bt, t // _SUBLANE, _SUBLANE, _LANE), axis=1)
        else:
            # Only reachable on the single-chunk path (t == rows_total, % 8 != 0).
            acc_ref[:, 0:1, :] += jnp.sum(sq, axis=1, keepdims=True)

    if mask_rows:
        # Keep the row mask out of the steady state: only the tail chunk pays
        # the iota/compare/select VALU cost.
        @pl.when(k < nk - 1)
        def _():
            accumulate(False)

        @pl.when(k == nk - 1)
        def _():
            accumulate(True)
    else:
        accumulate(False)

    @pl.when(k == nk - 1)
    def _():
        # Epilogue: sublane reduce + single folded scale (0.5 / num_joints).
        out_ref[...] = jnp.sum(acc_ref[...], axis=1, keepdims=True) * scale


def _loss_kernel_2d(pred_ref, tgt_ref, out_ref, acc_ref, *,
                    scale, cols_total, cols_per_block, mask_cols):
    """Grid step for the ragged fallback layout (Bv, L) with L % 128 != 0."""
    k = pl.program_id(1)
    nk = pl.num_programs(1)

    @pl.when(k == 0)
    def _():
        acc_ref[...] = jnp.zeros_like(acc_ref)

    def accumulate(apply_mask):
        d = pred_ref[...].astype(jnp.float32) - tgt_ref[...].astype(jnp.float32)
        sq = d * d                                        # (bt, Ct)
        if apply_mask:
            cols = (jax.lax.broadcasted_iota(jnp.int32, sq.shape, 1)
                    + k * cols_per_block)
            sq = jnp.where(cols < cols_total, sq, 0.0)
        acc_ref[...] += jnp.sum(sq, axis=1, keepdims=True)

    if mask_cols:
        @pl.when(k < nk - 1)
        def _():
            accumulate(False)

        @pl.when(k == nk - 1)
        def _():
            accumulate(True)
    else:
        accumulate(False)

    @pl.when(k == nk - 1)
    def _():
        out_ref[...] = acc_ref[...] * scale


def per_image_loss(output, target, target_weight=None):
    """Pallas TPU implementation of PerImageLoss.forward.

    output, target : (B, J, H, W) arrays (f32 or bf16; accumulation is f32,
        bf16 inputs halve HBM traffic for this bandwidth-bound kernel).
    target_weight  : accepted but unused — the reference forward never reads it.
    Returns        : (B,) float32 per-image loss.
    """
    del target_weight  # the PyTorch forward ignores it (even with use_target_weight=True)
    B, J, H, W = output.shape
    L = J * H * W
    scale = 0.5 / J
    itemsize = jnp.dtype(output.dtype).itemsize

    cost = pl.CostEstimate(
        flops=3 * B * L,
        transcendentals=0,
        bytes_accessed=2 * B * L * itemsize + B * _LANE * 4,
    )
    cparams = pltpu.CompilerParams(
        dimension_semantics=("parallel", "arbitrary"),
        vmem_limit_bytes=_VMEM_LIMIT_BYTES,
    )

    if L % _LANE == 0:
        # ------------- Fast path: lane-dense (Bv, Rv, 128) layout -------------
        R = L // _LANE
        S = 1
        if B == 1 and R % 2 == 0 and R >= 32:
            # Split a single image into two virtual halves (free reshape) so
            # the parallel grid axis has 2 blocks -> both v7x TCs stay busy.
            S = 2
        Bv, Rv = B * S, R // S
        pred = output.reshape(Bv, Rv, _LANE)   # contiguous -> free reshape
        tgt = target.reshape(Bv, Rv, _LANE)

        # ~4 MiB / input / buffer, multiple of 16 rows (full bf16 vregs).
        budget_rows = max(16, (_TILE_BYTES_PER_INPUT // (_LANE * itemsize) // 16) * 16)

        if Rv <= budget_rows:
            # Whole image per step; pack images per block to amortize the
            # ~0.35 us per-grid-step pipeline overhead.
            t_rows, n_k, mask_rows = Rv, 1, False
            bt = min(Bv, max(1, budget_rows // max(Rv, 1)))
            if Bv >= 2:
                bt = min(bt, pl.cdiv(Bv, 2))   # keep >= 2 parallel blocks (v7x)
        else:
            # Large images: chunk rows; only the tail chunk is masked (pl.when).
            t_rows = budget_rows
            n_k = pl.cdiv(Rv, t_rows)
            mask_rows = (Rv % t_rows) != 0
            bt = 1
        # The chunked path must keep the sublane-packed accumulator valid.
        assert n_k == 1 or t_rows % _SUBLANE == 0
        n_b = pl.cdiv(Bv, bt)   # ragged batch tail handled by boundary blocks

        kernel = functools.partial(
            _loss_kernel_3d, scale=scale, rows_total=Rv,
            rows_per_block=t_rows, mask_rows=mask_rows)

        out = pl.pallas_call(
            kernel,
            out_shape=jax.ShapeDtypeStruct((Bv, 1, _LANE), jnp.float32),
            grid_spec=pltpu.PrefetchScalarGridSpec(
                num_scalar_prefetch=0,
                grid=(n_b, n_k),
                in_specs=[
                    pl.BlockSpec((bt, t_rows, _LANE), lambda b, k: (b, k, 0)),
                    pl.BlockSpec((bt, t_rows, _LANE), lambda b, k: (b, k, 0)),
                ],
                out_specs=pl.BlockSpec((bt, 1, _LANE), lambda b, k: (b, 0, 0)),
                scratch_shapes=[pltpu.VMEM((bt, _SUBLANE, _LANE), jnp.float32)],
            ),
            compiler_params=cparams,
            cost_estimate=cost,
        )(pred, tgt)

        # Tiny final reduce over the 128 lane partials (and the virtual-image
        # split when S == 2); B*S*128 f32, fused by XLA.
        return jnp.sum(out.reshape(B, -1), axis=1)

    # --------- Ragged path: L % 128 != 0.  2D (B, L) layout, in-kernel lane
    # masking; no jnp.pad (which would add a full extra HBM read+write of both
    # inputs for this bandwidth-bound kernel). ---------
    pred = output.reshape(B, L)
    tgt = target.reshape(B, L)
    bt = B if B <= 16 else 16            # (8,128) rule: bt == B or a multiple of 8
    n_b = pl.cdiv(B, bt)
    ct_budget = max(_LANE, _TILE_BYTES_PER_INPUT // (bt * itemsize))
    if L <= ct_budget:
        ct, n_k, mask_cols = L, 1, False
    else:
        ct = max(_LANE, (ct_budget // _LANE) * _LANE)
        n_k = pl.cdiv(L, ct)
        mask_cols = (L % ct) != 0
    # TODO(synk): B == 1 on v7x keeps only one TensorCore busy on this rare
    # ragged-shape fallback; acceptable for the atypical-L corner case.

    kernel = functools.partial(
        _loss_kernel_2d, scale=scale, cols_total=L,
        cols_per_block=ct, mask_cols=mask_cols)

    out = pl.pallas_call(
        kernel,
        out_shape=jax.ShapeDtypeStruct((B, 1), jnp.float32),
        grid_spec=pltpu.PrefetchScalarGridSpec(
            num_scalar_prefetch=0,
            grid=(n_b, n_k),
            in_specs=[
                pl.BlockSpec((bt, ct), lambda b, k: (b, k)),
                pl.BlockSpec((bt, ct), lambda b, k: (b, k)),
            ],
            out_specs=pl.BlockSpec((bt, 1), lambda b, k: (b, 0)),
            scratch_shapes=[pltpu.VMEM((bt, 1), jnp.float32)],
        ),
        compiler_params=cparams,
        cost_estimate=cost,
    )(pred, tgt)
    return out[:, 0]


def per_image_loss_ref(output, target):
    """Pure-JAX reference mirroring the PyTorch forward exactly."""
    B, J = output.shape[0], output.shape[1]
    p = output.reshape(B, J, -1).astype(jnp.float32)
    t = target.reshape(B, J, -1).astype(jnp.float32)
    loss = jnp.sum(0.5 * (p - t) ** 2, axis=1)   # sum over joints -> (B, H*W)
    return jnp.sum(loss, axis=1) / J             # sum over pixels / J -> (B,)


if __name__ == "__main__":
    key = jax.random.PRNGKey(0)
    B, J, H, W = 2, 4, 16, 16
    k1, k2, k3 = jax.random.split(key, 3)
    output = jax.random.normal(k1, (B, J, H, W), dtype=jnp.float32)
    target = jax.random.normal(k2, (B, J, H, W), dtype=jnp.float32)
    target_weight = jax.random.uniform(k3, (B, J, 1), dtype=jnp.float32)

    loss = jax.block_until_ready(per_image_loss(output, target, target_weight))
    ref = per_image_loss_ref(output, target)
    assert loss.shape == (B,), loss.shape
    assert jnp.allclose(loss, ref, rtol=1e-5, atol=1e-5), (loss, ref)

    # Also exercise the ragged-L fallback (L % 128 != 0 -> 2D masked path, no pad).
    B2, J2, H2, W2 = 3, 3, 9, 10
    o2 = jax.random.normal(k1, (B2, J2, H2, W2), dtype=jnp.float32)
    t2 = jax.random.normal(k2, (B2, J2, H2, W2), dtype=jnp.float32)
    loss2 = jax.block_until_ready(per_image_loss(o2, t2))
    ref2 = per_image_loss_ref(o2, t2)
    assert loss2.shape == (B2,), loss2.shape
    assert jnp.allclose(loss2, ref2, rtol=1e-5, atol=1e-5), (loss2, ref2)

    print("KERNEL_OK")
</pallas_src>

<mosaic_0001>
module attributes {stable_mosaic.version = 11 : i64} {
  func.func @_loss_kernel_3d(%arg0: i32, %arg1: i32, %arg2: memref<1x8x128xf32, #tpu.memory_space<vmem>>, %arg3: memref<1x8x128xf32, #tpu.memory_space<vmem>>, %arg4: memref<1x1x128xf32, #tpu.memory_space<vmem>>, %arg5: memref<1x8x128xf32, #tpu.memory_space<vmem>>) attributes {dimension_semantics = [#tpu.dimension_semantics<parallel>, #tpu.dimension_semantics<arbitrary>], iteration_bounds = array<i64: 2, 1>, scalar_prefetch = 0 : i64, scratch_operands = 1 : i64, tpu.core_type = #tpu.core_type<tc>, window_params = [{transform_indices = @transform_0, window_bounds = array<i64: 1, 8, 128>}, {transform_indices = @transform_1, window_bounds = array<i64: 1, 8, 128>}, {transform_indices = @transform_2, window_bounds = array<i64: 1, 1, 128>}]} {
    %c0_i32 = arith.constant 0 : i32
    %0 = arith.cmpi eq, %arg1, %c0_i32 : i32
    %1 = arith.extui %0 : i1 to i32
    %c0_i32_0 = arith.constant 0 : i32
    %2 = arith.cmpi ne, %1, %c0_i32_0 : i32
    scf.if %2 {
      %cst_14 = arith.constant 0.000000e+00 : f32
      %15 = vector.broadcast %cst_14 : f32 to vector<1x8x128xf32>
      %c0_15 = arith.constant 0 : index
      %c0_16 = arith.constant 0 : index
      %c0_17 = arith.constant 0 : index
      %16 = vector.load %arg5[%c0_15, %c0_16, %c0_17] : memref<1x8x128xf32, #tpu.memory_space<vmem>>, vector<1x8x128xf32>
      tpu.vector_store %arg5[%c0_15, %c0_16, %c0_17], %15 {strides = array<i32>} : memref<1x8x128xf32, #tpu.memory_space<vmem>>, vector<1x8x128xf32>,
    } else {
    }
    %c0 = arith.constant 0 : index
    %c0_1 = arith.constant 0 : index
    %c0_2 = arith.constant 0 : index
    %3 = vector.load %arg2[%c0, %c0_1, %c0_2] : memref<1x8x128xf32, #tpu.memory_space<vmem>>, vector<1x8x128xf32>
    %c0_3 = arith.constant 0 : index
    %c0_4 = arith.constant 0 : index
    %c0_5 = arith.constant 0 : index
    %4 = vector.load %arg3[%c0_3, %c0_4, %c0_5] : memref<1x8x128xf32, #tpu.memory_space<vmem>>, vector<1x8x128xf32>
    %5 = arith.subf %3, %4 : vector<1x8x128xf32>
    %6 = arith.mulf %5, %5 : vector<1x8x128xf32>
    %c0_6 = arith.constant 0 : index
    %c0_7 = arith.constant 0 : index
    %c0_8 = arith.constant 0 : index
    %7 = vector.load %arg5[%c0_6, %c0_7, %c0_8] : memref<1x8x128xf32, #tpu.memory_space<vmem>>, vector<1x8x128xf32>
    %8 = vector.shape_cast %6 : vector<1x8x128xf32> to vector<1x1x8x128xf32>
    %cst = arith.constant dense<0.000000e+00> : vector<1x8x128xf32>
    %9 = vector.multi_reduction <add>, %8, %cst [1] : vector<1x1x8x128xf32> to vector<1x8x128xf32>
    %10 = arith.addf %7, %9 : vector<1x8x128xf32>
    %c0_9 = arith.constant 0 : index
    %c0_10 = arith.constant 0 : index
    %c0_11 = arith.constant 0 : index
    %11 = vector.load %arg5[%c0_9, %c0_10, %c0_11] : memref<1x8x128xf32, #tpu.memory_space<vmem>>, vector<1x8x128xf32>
    tpu.vector_store %arg5[%c0_9, %c0_10, %c0_11], %10 {strides = array<i32>} : memref<1x8x128xf32, #tpu.memory_space<vmem>>, vector<1x8x128xf32>,
    %c0_i32_12 = arith.constant 0 : i32
    %12 = arith.cmpi eq, %arg1, %c0_i32_12 : i32
    %13 = arith.extui %12 : i1 to i32
    %c0_i32_13 = arith.constant 0 : i32
    %14 = arith.cmpi ne, %13, %c0_i32_13 : i32
    scf.if %14 {
      %c0_14 = arith.constant 0 : index
      %c0_15 = arith.constant 0 : index
      %c0_16 = arith.constant 0 : index
      %15 = vector.load %arg5[%c0_14, %c0_15, %c0_16] : memref<1x8x128xf32, #tpu.memory_space<vmem>>, vector<1x8x128xf32>
      %cst_17 = arith.constant dense<0.000000e+00> : vector<1x128xf32>
      %16 = vector.multi_reduction <add>, %15, %cst_17 [1] : vector<1x8x128xf32> to vector<1x128xf32>
      %17 = vector.shape_cast %16 : vector<1x128xf32> to vector<1x1x128xf32>
      %cst_18 = arith.constant 1.250000e-01 : f32
      %18 = vector.broadcast %cst_18 : f32 to vector<1x1x128xf32>
      %19 = arith.mulf %17, %18 : vector<1x1x128xf32>
      %c0_19 = arith.constant 0 : index
      %c0_20 = arith.constant 0 : index
      %c0_21 = arith.constant 0 : index
      %20 = vector.load %arg4[%c0_19, %c0_20, %c0_21] : memref<1x1x128xf32, #tpu.memory_space<vmem>>, vector<1x1x128xf32>
      tpu.vector_store %arg4[%c0_19, %c0_20, %c0_21], %19 {strides = array<i32>} : memref<1x1x128xf32, #tpu.memory_space<vmem>>, vector<1x1x128xf32>,
    } else {
    }
    return
  }
  func.func @transform_0(%arg0: i32, %arg1: i32) -> (i32, i32, i32) {
    %c0_i32 = arith.constant 0 : i32
    %c0_i32_0 = arith.constant 0 : i32
    return %arg0, %arg1, %c0_i32 : i32, i32, i32
  }
  func.func @transform_1(%arg0: i32, %arg1: i32) -> (i32, i32, i32) {
    %c0_i32 = arith.constant 0 : i32
    %c0_i32_0 = arith.constant 0 : i32
    return %arg0, %arg1, %c0_i32 : i32, i32, i32
  }
  func.func @transform_2(%arg0: i32, %arg1: i32) -> (i32, i32, i32) {
    %c0_i32 = arith.constant 0 : i32
    %c0_i32_0 = arith.constant 0 : i32
    %c0_i32_1 = arith.constant 0 : i32
    return %arg0, %c0_i32, %c0_i32_0 : i32, i32, i32
  }
}

</mosaic_0001>

<bundles_post_ra>
// kernel: tpu_custom_call.1
= control target key start
LH: loop header
LB: loop body
LE: loop exit
PB: predicated region body
PF: predicated region fallthrough
CT: control target
= control target key end

     0   :  { %7 = vsyncpa [#allocation4], 0  ;;  %s726_s0 = inlined_call_operand.hbm [shape: f32[2,8,128], index: 0, kind: input, shape index: {}]   ;;  %s727_s1 = inlined_call_operand.hbm [shape: f32[2,8,128], index: 1, kind: input, shape index: {}]   ;;  %s728_s2 = inlined_call_operand.hbm [shape: f32[2,1,128], index: 2, kind: output, shape index: {}]  }
   0x1   :  { %9 = vsyncpa [#allocation4 + $0x1], 0 }
   0x2   :  { %10 = vsyncpa [#allocation7], 0 }
   0x3   :  { %12 = vsyncpa [#allocation7 + $0x1], 0 }
   0x4   :  { %13 = vsyncpa [#allocation5], 0 }
   0x5   :  { %15 = vsyncpa [#allocation5 + $0x1], 0  ;;  %s597_s9 = smov 0   ;;  %s599_s10 = smov 0  }
   0x6   :  { %s601_s11 = smov 0   ;;  %s603_s12 = smov 0  }
   0x7   :  { %s605_s13 = smov 0   ;;  %s607_s14 = smov 0  }
   0x8 LB: > { %s354_s15 = sadd.s32 4294967295, %s580_s14   ;;  %s355_s16 = sadd.s32 4294967294, %s580_s14   ;;  %s580_s14 = sphi %s607_s14, %s21_s14   ;;  %s576_s13 = sphi %s605_s13, %s737_s13   ;;  %s572_s12 = sphi %s603_s12, %s736_s12   ;;  %s568_s11 = sphi %s601_s11, %s735_s11   ;;  %s564_s10 = sphi %s599_s10, %s734_s10   ;;  %s560_s9 = sphi %s597_s9, %s733_s9  }
   0x9   : > { %s33_s17 = sadd.s32 1, %s576_s13  ;;  %s42_s18 = sadd.s32 1, %s568_s11 }
   0xa   : > { %p35_p0 = scmp.ge.s32.totalorder %s33_s17, 2  ;;  %p49_p1 = scmp.ne.s32.totalorder %s568_s11, %s564_s10 }
   0xb   : > { %p50_p2 = scmp.eq.s32.totalorder %s580_s14, 0  ;;  %p55_p3 = scmp.ne.s32.totalorder %s564_s10, %s560_s9 }
   0xc   : > { %s739_s17 = smov (%p35_p0, %s33_s17), 0  ;;  %p56_p5 = scmp.eq.s32.totalorder %s354_s15, 0 }
   0xd   : > { %p638_p4 = por %p50_p2, %p49_p1  ;;  %s37_s20 = ssub.s32 %s576_s13, %s739_s17 }
   0xe   : > { %p107_p6 = scmp.eq.s32.totalorder %s354_s15, 1  ;;  %p40_p7 = scmp.eq.s32.totalorder %s37_s20, 0 }
   0xf   : > { %p644_p8 = por %p56_p5, %p55_p3  ;;  %p113_p10 = scmp.eq.s32.totalorder %s355_s16, 1 }
  0x10   : > { %p648_p9 = por %p107_p6, %p49_p1  ;;  %p357_p12 = scmp.ge.s32.totalorder %s580_s14, 2 }
  0x11   : > { %s653_s23 = scalar_select %p40_p7, %s568_s11, %s42_s18  }
  0x12   : > { %p655_p11 = por %p113_p10, %p55_p3  ;;  %p384_p13 = scmp.lt.s32.totalorder %s580_s14, 2 }
  0x13   : > { %s133_s25 = sand.u32 1, %s568_s11   ;;  %s359_s27 = sshll.u32 %s576_s13, 3 }
  0x14   : > { %s358_s26 = sshll.u32 %s133_s25, 3  ;;  %s142_s30 = scalar_lea.hbm %s726_s0, %s359_s27 }
  0x15   : > { %s137_s3 = scalar_lea.vmem [#allocation3], %s358_s26  ;;  %s144_s5 = sshll.u32 %s142_s30, 4  ;;  %s145_s5 = int_to_ptr.hbm [resolvable:$true] %s144_s5 }
  0x16   : > { %s146_s4 = sshll.u32 %s137_s3, 4  ;;  %p374_p0 = pnand %p384_p13, %p638_p4  ;;  %s147_s4 = int_to_ptr.vmem [resolvable:$true] %s146_s4 }
  0x17   : > { %p362_p1 = scmp.ge.s32.totalorder %s580_s14, 1  ;;  %p171_p2 = scmp.lt.s32.totalorder %s580_s14, 3 }
  0x18   : > { %s134_s6 = scalar_lea.sflag [#allocation4], %s133_s25  ;;  %s162_s15 = scalar_lea.hbm %s727_s1, %s359_s27 }
  0x19   : > { %376 = dma.hbm_to_vmem [thread:$0]  (!%p374_p0), %s145_s5, 128, %s147_s4, %s134_s6  }
  0x1a   : > { %p172_p3 = pnand %p362_p1, %p171_p2  ;;  %s157_s16 = scalar_lea.vmem [#allocation6], %s358_s26 }
  0x1b   : > { %s166_s18 = sshll.u32 %s157_s16, 4  ;;  %s164_s20 = sshll.u32 %s162_s15, 4  ;;  %s167_s18 = int_to_ptr.vmem [resolvable:$true] %s166_s18  ;;  %s165_s20 = int_to_ptr.hbm [resolvable:$true] %s164_s20 }
  0x1c   : > { %s154_s28 = scalar_lea.sflag [#allocation7], %s133_s25  ;;  %175 = sbr.rel (%p172_p3) target bundleno = 58 (0x3a), region = 28 }
  0x1d   : > { %379 = dma.hbm_to_vmem [thread:$0]  (!%p374_p0), %s165_s20, 128, %s167_s18, %s154_s28  }
  0x1e   : > { %s674_s19 = sand.u32 (!%p172_p3), 1, %s564_s10  }
  0x1f   : > { %s363_s29 = sshll.u32 (!%p172_p3), %s674_s19, 3  ;;  %s178_s30 = scalar_lea.sflag (!%p172_p3), [#allocation4], %s674_s19 }
  0x20   : > { %s181_s3 = scalar_lea.vmem (!%p172_p3), [#allocation3], %s363_s29 }
  0x21   : > { %547 = dma.done.wait (%p644_p8), %s178_s30, 128  }
  0x22   : > { %549 = vsyncadd (%p644_p8), %s178_s30, 4294967168  ;;  %s188_s26 = scalar_lea.sflag [#allocation7], %s674_s19  ;;  %s191_s25 = scalar_lea.vmem [#allocation6], %s363_s29 }
  0x23   : > { %551 = dma.done.wait (%p644_p8), %s188_s26, 128  }
  0x24   : > { %553 = vsyncadd (%p644_p8), %s188_s26, 4294967168  ;;  %v222_v0 = vld [vmem:[%s181_s3] sm:$0xff]  ;;  %v223_v1 = vld [vmem:[%s191_s25] sm:$0xff]  ;;  %s251_s5 = scalar_lea.hbm %s728_s2, %s572_s12  ;;  %s216_s6 = scalar_lea.vmem [#allocation8], %s674_s19 }
  0x25   : > { %v224_v2 = vsub.f32 %v222_v0, %v223_v1  ;;  %s253_s21 = sshll.u32 %s216_s6, 4  ;;  %s255_s7 = sshll.u32 %s251_s5, 4  ;;  %s254_s21 = int_to_ptr.vmem [resolvable:$true] %s253_s21  ;;  %s256_s7 = int_to_ptr.hbm [resolvable:$true] %s255_s7 }
  0x26   : > { %s243_s8 = scalar_lea.sflag [#allocation5], %s674_s19  ;;  %s508_s15 = sshra.s32 %s256_s7, 4  ;;  %s509_s15 = int_to_ptr.hbm [resolvable:$true] %s508_s15 }
  0x27   : > { %v225_v3 = vmul.f32 %v224_v2, %v224_v2  ;;  %s510_s16 = scalar_lea.hbm %s509_s15, 1  ;;  %s514_s12 = scalar_lea.hbm %s728_s2, 2 }
  0x28   : > { %p511_p4 = scmp.ne.s32.totalorder %s509_s15, %s510_s16  ;;  %p515_p7 = scmp.lt.s32.totalorder %s509_s15, %s728_s2 }
  0x29   : > { %v234_v4 = vrot.slane %v225_v3, 4  ;;  %p516_p8 = scmp.lt.s32.totalorder %s514_s12, %s510_s16 }
  0x2a   : > { %p512_p5 = pnand %p511_p4, %p648_p9 }
  0x2b   : > { %v235_v5 = vadd.f32 %v234_v4, %v225_v3  ;;  %p517_p10 = por %p516_p8, %p515_p7 }
  0x2c   : > { %p513_p6 = pneg %p512_p5 }
  0x2d   : > { %v236_v6 = vrot.slane %v235_v5, 2 }
  0x2e   : > { %p518_p13 = pnand %p517_p10, %p513_p6 }
  0x2f   : > { %v237_v7 = vadd.f32 %v236_v6, %v235_v5 }
  0x31   : > { %v238_v8 = vrot.slane %v237_v7, 1 }
  0x33   : > { %v239_v9 = vadd.f32 %v238_v8, %v237_v7 }
  0x35   : > { %v240_v10 = vmul.f32 0.125, %v239_v9 }
  0x37   : > { %241 = vst [vmem:[%s216_s6] sm:$0x1] %v240_v10 }
  0x38   : > { %521 = shalt.err (!%p518_p13)
}
  0x39   : > { %371 = dma.vmem_to_hbm [thread:$0]  (%p648_p9), %s254_s21, 16, %s256_s7, %s243_s8  }
  0x3a PF: > { %s267_s19 = sand.u32 1, %s560_s9   ;;  %p381_p0 = pnand %p357_p12, %p655_p11 }
  0x3b   : > { %s268_s30 = scalar_lea.sflag [#allocation5], %s267_s19 }
  0x3c   : > { %p382_p1 = pneg %p381_p0 }
  0x3e   : > { %555 = dma.done.wait (%p382_p1), %s268_s30, 16  }
  0x3f   : > { %557 = vsyncadd (%p382_p1), %s268_s30, 4294967280  ;;  %s21_s14 = sadd.s32 1, %s580_s14   ;;  %s733_s9 = smov %s564_s10 }
  0x40   : > { %p18_p2 = scmp.ge.s32.totalorder %s21_s14, 4   ;;  %s734_s10 = smov %s568_s11 }
  0x41   : > { %s735_s11 = smov %s653_s23  ;;  %s736_s12 = smov %s576_s13 }
  0x42   : > { %s737_s13 = smov %s739_s17  ;;  %20 = sbr.rel (!%p18_p2) target bundleno = 8 (0x8), region = 94 }
  0x47   :  { %273 = vsyncpa [#allocation4], 1 }
  0x48   :  { %275 = vsyncpa [#allocation4 + $0x1], 1 }
  0x49   :  { %276 = vsyncpa [#allocation7], 1 }
  0x4a   :  { %278 = vsyncpa [#allocation7 + $0x1], 1 }
  0x4b   :  { %279 = vsyncpa [#allocation5], 1 }
  0x4c   :  { %281 = vsyncpa [#allocation5 + $0x1], 1 }

</bundles_post_ra>
